<compile_context>
chip_gen: v7x
topology: tpu7x:2x2x1
jax: 0.10.0
libtpu: 0.0.40
codegen_flags: <defaults>
</compile_context>

<pallas_src>
import functools

import jax
import jax.numpy as jnp
import numpy as np
from jax.experimental import pallas as pl
from jax.experimental.pallas import tpu as pltpu


def _gru_kernel(ids_ref, emb_ref, wih_ref, whh_ref, bih_ref, bhh_ref,
                out_ref, x_scratch, xproj_ref, *, seq_len, batch, hidden):
    """Embedding gather + full GRU recurrence (PyTorch gate order r, z, n).

    ids_ref   : (S*B,)      int32 token ids (SMEM, scalar-prefetched)
    emb_ref   : (V, 1, E)   embedding table (VMEM; leading axis = gather index)
    wih_ref   : (E, 3H)     fused input weights  [r | z | n]
    whh_ref   : (H, 3H)     fused hidden weights [r | z | n]
    bih_ref   : (1, 3H)     fused input bias
    bhh_ref   : (1, 3H)     fused hidden bias
    out_ref   : (S*B, H)    all hidden states
    x_scratch : (S*B, E)    VMEM scratch for gathered embedding rows
    xproj_ref : (S*B, 3H)   VMEM scratch for the batched input projections
    """
    H = hidden
    SB = seq_len * batch

    # In-kernel embedding gather: SMEM scalar id -> one VMEM row copy per token.
    # Replaces the wrapper-side jnp.take + HBM round-trip of `embedded`.
    # TODO(synk): for a large vocabulary the table would not fit VMEM; switch to
    # per-row DMA gather from an HBM ref (memory_space=pl.ANY) at real sizes.
    for t in range(SB):                                   # tiny static trip count
        x_scratch[pl.ds(t, 1), :] = emb_ref[ids_ref[t]]   # (1, E) row

    # Pre-pass: input-side projections for ALL timesteps in one MXU matmul
    # (no sequential dependence), biases included.
    xproj_ref[...] = (
        jnp.dot(x_scratch[...], wih_ref[...], preferred_element_type=jnp.float32)
        + bih_ref[...]
    )

    # Hoist loop-invariant weight/bias loads out of the recurrence.
    w_hh = whh_ref[...]
    b_hh = bhh_ref[...]

    # TODO(synk): W_hh could be held resident in the MXU across timesteps via
    # pltpu.matmul_push_rhs / matmul_acc_lhs / matmul_pop; kept as jnp.dot for
    # lowering robustness at these tiny shapes.
    def step(t, h):
        # (B, 3H) precomputed input gates for timestep t.
        i_all = xproj_ref[pl.ds(t * batch, batch), :]
        # Single fused hidden-side matmul per step (the only serial matmul).
        h_all = jnp.dot(h, w_hh, preferred_element_type=jnp.float32) + b_hh

        # One EUP push for both sigmoid gates (2H = 64 lanes, one vreg).
        rz = jax.nn.sigmoid(i_all[:, 0:2 * H] + h_all[:, 0:2 * H])
        r = rz[:, 0:H]
        z = rz[:, H:2 * H]
        # b_hh[n] stays inside the r * (W_hn h + b_hn) term (torch semantics).
        n = jnp.tanh(i_all[:, 2 * H:3 * H] + r * h_all[:, 2 * H:3 * H])
        # Reassociated blend: (1-z)*n + z*h == n + z*(h - n), one fewer VPU op.
        h_new = n + z * (h - n)

        # VMEM store; HBM writeback of the whole (S*B, H) block happens once.
        out_ref[pl.ds(t * batch, batch), :] = h_new.astype(out_ref.dtype)
        return h_new

    # self.hidden = torch.zeros(1, 1, hidden_size)  ->  h0 = 0
    h0 = jnp.zeros((batch, H), jnp.float32)
    jax.lax.fori_loop(0, seq_len, step, h0, unroll=True)


def prepare_params(emb_table, w_ih, w_hh, b_ih, b_hh):
    """One-time (parameter-load-time) layout prep — keeps the transpose /
    reshape HLOs off the per-call hot path.

    emb_table : (V, E) f32
    w_ih      : (3H, E) torch weight_ih_l0 layout (rows [r; z; n])
    w_hh      : (3H, H) torch weight_hh_l0 layout
    b_ih,b_hh : (3H,)   torch bias layout
    """
    V, E = emb_table.shape
    H = w_hh.shape[1]
    emb3 = emb_table.reshape(V, 1, E)     # gather index on the leading axis
    w_ih_f = w_ih.T                       # (E, 3H), columns [r | z | n]
    w_hh_f = w_hh.T                       # (H, 3H)
    b_ih_f = b_ih.reshape(1, 3 * H)
    b_hh_f = b_hh.reshape(1, 3 * H)
    return emb3, w_ih_f, w_hh_f, b_ih_f, b_hh_f


@jax.jit
def encoder_gru_forward(input_ids, emb3, w_ih_f, w_hh_f, b_ih_f, b_hh_f):
    """
    input_ids : (seq_len, batch) int32
    emb3      : (V, 1, E) f32   (from prepare_params)
    w_*_f     : fused weights/biases (from prepare_params)
    returns   : (seq_len, batch, H) f32
    """
    seq_len, batch = input_ids.shape
    V, _, E = emb3.shape
    H = w_hh_f.shape[0]
    SB = seq_len * batch

    ids_flat = input_ids.reshape(SB).astype(jnp.int32)

    kernel = functools.partial(
        _gru_kernel, seq_len=seq_len, batch=batch, hidden=H)

    grid_spec = pltpu.PrefetchScalarGridSpec(
        num_scalar_prefetch=1,          # ids -> SMEM, passed first to the kernel
        grid=(1,),                      # whole recurrence in one invocation
        in_specs=[
            pl.BlockSpec((V, 1, E), lambda i, ids: (0, 0, 0)),      # emb table
            pl.BlockSpec((E, 3 * H), lambda i, ids: (0, 0)),        # W_ih fused
            pl.BlockSpec((H, 3 * H), lambda i, ids: (0, 0)),        # W_hh fused
            pl.BlockSpec((1, 3 * H), lambda i, ids: (0, 0)),        # b_ih fused
            pl.BlockSpec((1, 3 * H), lambda i, ids: (0, 0)),        # b_hh fused
        ],
        out_specs=pl.BlockSpec((SB, H), lambda i, ids: (0, 0)),
        scratch_shapes=[
            pltpu.VMEM((SB, E), jnp.float32),        # gathered embeddings
            pltpu.VMEM((SB, 3 * H), jnp.float32),    # batched input projections
        ],
    )

    out_flat = pl.pallas_call(
        kernel,
        out_shape=jax.ShapeDtypeStruct((SB, H), jnp.float32),
        grid_spec=grid_spec,
        compiler_params=pltpu.CompilerParams(
            dimension_semantics=("arbitrary",),
        ),
    )(ids_flat, emb3, w_ih_f, w_hh_f, b_ih_f, b_hh_f)

    return out_flat.reshape(seq_len, batch, H)


def _reference_gru(input_ids, emb_table, w_ih, w_hh, b_ih, b_hh):
    """Pure-JAX reference mirroring torch.nn.GRU semantics (torch layouts)."""
    H = w_hh.shape[1]
    batch = input_ids.shape[1]
    embedded = jnp.take(emb_table, input_ids, axis=0)        # (S, B, E)
    w_ir, w_iz, w_in = jnp.split(w_ih, 3, axis=0)            # each (H, E)
    w_hr, w_hz, w_hn = jnp.split(w_hh, 3, axis=0)            # each (H, H)
    b_ir, b_iz, b_in = jnp.split(b_ih, 3)
    b_hr, b_hz, b_hn = jnp.split(b_hh, 3)
    h0 = jnp.zeros((batch, H), jnp.float32)

    def step(h, x):
        r = jax.nn.sigmoid(x @ w_ir.T + b_ir + h @ w_hr.T + b_hr)
        z = jax.nn.sigmoid(x @ w_iz.T + b_iz + h @ w_hz.T + b_hz)
        n = jnp.tanh(x @ w_in.T + b_in + r * (h @ w_hn.T + b_hn))
        h_new = (1.0 - z) * n + z * h
        return h_new, h_new

    _, outs = jax.lax.scan(step, h0, embedded)
    return outs  # (S, B, H)


if __name__ == "__main__":
    # Small shapes consistent with the module's forward.
    DICT_SIZE = 50
    EMB = 32          # embedding_size
    HID = 32          # hidden_size
    SEQ = 8
    BATCH = 1         # module's hidden init (1, 1, H) implies batch_size == 1

    key = jax.random.PRNGKey(0)
    k_emb, k_wih, k_whh, k_bih, k_bhh, k_ids = jax.random.split(key, 6)

    # Parameters in native torch layouts (nn.Embedding / nn.GRU).
    bound = 1.0 / np.sqrt(HID)
    emb_table = jax.random.normal(k_emb, (DICT_SIZE, EMB), jnp.float32)
    w_ih = jax.random.uniform(k_wih, (3 * HID, EMB), jnp.float32, -bound, bound)
    w_hh = jax.random.uniform(k_whh, (3 * HID, HID), jnp.float32, -bound, bound)
    b_ih = jax.random.uniform(k_bih, (3 * HID,), jnp.float32, -bound, bound)
    b_hh = jax.random.uniform(k_bhh, (3 * HID,), jnp.float32, -bound, bound)

    input_ids = jax.random.randint(k_ids, (SEQ, BATCH), 0, DICT_SIZE, jnp.int32)

    # One-time parameter prep (off the per-call hot path).
    emb3, w_ih_f, w_hh_f, b_ih_f, b_hh_f = prepare_params(
        emb_table, w_ih, w_hh, b_ih, b_hh)

    out = encoder_gru_forward(input_ids, emb3, w_ih_f, w_hh_f, b_ih_f, b_hh_f)
    out = jax.block_until_ready(out)

    ref = _reference_gru(input_ids, emb_table, w_ih, w_hh, b_ih, b_hh)
    np.testing.assert_allclose(np.asarray(out), np.asarray(ref),
                               rtol=1e-5, atol=1e-5)

    assert out.shape == (SEQ, BATCH, HID)
    print("KERNEL_OK")
</pallas_src>

<mosaic_0001>
module attributes {stable_mosaic.version = 11 : i64} {
  func.func @_gru_kernel(%arg0: i32, %arg1: memref<8xi32, #tpu.memory_space<smem>>, %arg2: memref<50x1x32xf32, #tpu.memory_space<vmem>>, %arg3: memref<32x96xf32, #tpu.memory_space<vmem>>, %arg4: memref<32x96xf32, #tpu.memory_space<vmem>>, %arg5: memref<1x96xf32, #tpu.memory_space<vmem>>, %arg6: memref<1x96xf32, #tpu.memory_space<vmem>>, %arg7: memref<8x32xf32, #tpu.memory_space<vmem>>, %arg8: memref<8x32xf32, #tpu.memory_space<vmem>>, %arg9: memref<8x96xf32, #tpu.memory_space<vmem>>) attributes {dimension_semantics = [#tpu.dimension_semantics<arbitrary>], iteration_bounds = array<i64: 1>, scalar_prefetch = 1 : i64, scratch_operands = 2 : i64, tpu.core_type = #tpu.core_type<tc>, window_params = [{pipeline_mode = #tpu.pipeline_mode<synchronous>, transform_indices = @transform_0, window_bounds = array<i64: 50, 1, 32>}, {pipeline_mode = #tpu.pipeline_mode<synchronous>, transform_indices = @transform_1, window_bounds = array<i64: 32, 96>}, {pipeline_mode = #tpu.pipeline_mode<synchronous>, transform_indices = @transform_2, window_bounds = array<i64: 32, 96>}, {pipeline_mode = #tpu.pipeline_mode<synchronous>, transform_indices = @transform_3, window_bounds = array<i64: 1, 96>}, {pipeline_mode = #tpu.pipeline_mode<synchronous>, transform_indices = @transform_4, window_bounds = array<i64: 1, 96>}, {pipeline_mode = #tpu.pipeline_mode<synchronous>, transform_indices = @transform_5, window_bounds = array<i64: 8, 32>}]} {
    %c0 = arith.constant 0 : index
    %0 = memref.load %arg1[%c0] : memref<8xi32, #tpu.memory_space<smem>>
    %1 = arith.index_cast %0 : i32 to index
    %c0_0 = arith.constant 0 : index
    %c0_1 = arith.constant 0 : index
    %2 = vector.load %arg2[%1, %c0_0, %c0_1] : memref<50x1x32xf32, #tpu.memory_space<vmem>>, vector<1x1x32xf32>
    %3 = vector.shape_cast %2 : vector<1x1x32xf32> to vector<1x32xf32>
    %c0_2 = arith.constant 0 : index
    %c0_3 = arith.constant 0 : index
    %4 = vector.load %arg8[%c0_2, %c0_3] : memref<8x32xf32, #tpu.memory_space<vmem>>, vector<1x32xf32>
    tpu.vector_store %arg8[%c0_2, %c0_3], %3 {strides = array<i32>} : memref<8x32xf32, #tpu.memory_space<vmem>>, vector<1x32xf32>,
    %c1 = arith.constant 1 : index
    %5 = memref.load %arg1[%c1] : memref<8xi32, #tpu.memory_space<smem>>
    %6 = arith.index_cast %5 : i32 to index
    %c0_4 = arith.constant 0 : index
    %c0_5 = arith.constant 0 : index
    %7 = vector.load %arg2[%6, %c0_4, %c0_5] : memref<50x1x32xf32, #tpu.memory_space<vmem>>, vector<1x1x32xf32>
    %8 = vector.shape_cast %7 : vector<1x1x32xf32> to vector<1x32xf32>
    %c1_6 = arith.constant 1 : index
    %c0_7 = arith.constant 0 : index
    %9 = vector.load %arg8[%c1_6, %c0_7] : memref<8x32xf32, #tpu.memory_space<vmem>>, vector<1x32xf32>
    tpu.vector_store %arg8[%c1_6, %c0_7], %8 {strides = array<i32>} : memref<8x32xf32, #tpu.memory_space<vmem>>, vector<1x32xf32>,
    %c2 = arith.constant 2 : index
    %10 = memref.load %arg1[%c2] : memref<8xi32, #tpu.memory_space<smem>>
    %11 = arith.index_cast %10 : i32 to index
    %c0_8 = arith.constant 0 : index
    %c0_9 = arith.constant 0 : index
    %12 = vector.load %arg2[%11, %c0_8, %c0_9] : memref<50x1x32xf32, #tpu.memory_space<vmem>>, vector<1x1x32xf32>
    %13 = vector.shape_cast %12 : vector<1x1x32xf32> to vector<1x32xf32>
    %c2_10 = arith.constant 2 : index
    %c0_11 = arith.constant 0 : index
    %14 = vector.load %arg8[%c2_10, %c0_11] : memref<8x32xf32, #tpu.memory_space<vmem>>, vector<1x32xf32>
    tpu.vector_store %arg8[%c2_10, %c0_11], %13 {strides = array<i32>} : memref<8x32xf32, #tpu.memory_space<vmem>>, vector<1x32xf32>,
    %c3 = arith.constant 3 : index
    %15 = memref.load %arg1[%c3] : memref<8xi32, #tpu.memory_space<smem>>
    %16 = arith.index_cast %15 : i32 to index
    %c0_12 = arith.constant 0 : index
    %c0_13 = arith.constant 0 : index
    %17 = vector.load %arg2[%16, %c0_12, %c0_13] : memref<50x1x32xf32, #tpu.memory_space<vmem>>, vector<1x1x32xf32>
    %18 = vector.shape_cast %17 : vector<1x1x32xf32> to vector<1x32xf32>
    %c3_14 = arith.constant 3 : index
    %c0_15 = arith.constant 0 : index
    %19 = vector.load %arg8[%c3_14, %c0_15] : memref<8x32xf32, #tpu.memory_space<vmem>>, vector<1x32xf32>
    tpu.vector_store %arg8[%c3_14, %c0_15], %18 {strides = array<i32>} : memref<8x32xf32, #tpu.memory_space<vmem>>, vector<1x32xf32>,
    %c4 = arith.constant 4 : index
    %20 = memref.load %arg1[%c4] : memref<8xi32, #tpu.memory_space<smem>>
    %21 = arith.index_cast %20 : i32 to index
    %c0_16 = arith.constant 0 : index
    %c0_17 = arith.constant 0 : index
    %22 = vector.load %arg2[%21, %c0_16, %c0_17] : memref<50x1x32xf32, #tpu.memory_space<vmem>>, vector<1x1x32xf32>
    %23 = vector.shape_cast %22 : vector<1x1x32xf32> to vector<1x32xf32>
    %c4_18 = arith.constant 4 : index
    %c0_19 = arith.constant 0 : index
    %24 = vector.load %arg8[%c4_18, %c0_19] : memref<8x32xf32, #tpu.memory_space<vmem>>, vector<1x32xf32>
    tpu.vector_store %arg8[%c4_18, %c0_19], %23 {strides = array<i32>} : memref<8x32xf32, #tpu.memory_space<vmem>>, vector<1x32xf32>,
    %c5 = arith.constant 5 : index
    %25 = memref.load %arg1[%c5] : memref<8xi32, #tpu.memory_space<smem>>
    %26 = arith.index_cast %25 : i32 to index
    %c0_20 = arith.constant 0 : index
    %c0_21 = arith.constant 0 : index
    %27 = vector.load %arg2[%26, %c0_20, %c0_21] : memref<50x1x32xf32, #tpu.memory_space<vmem>>, vector<1x1x32xf32>
    %28 = vector.shape_cast %27 : vector<1x1x32xf32> to vector<1x32xf32>
    %c5_22 = arith.constant 5 : index
    %c0_23 = arith.constant 0 : index
    %29 = vector.load %arg8[%c5_22, %c0_23] : memref<8x32xf32, #tpu.memory_space<vmem>>, vector<1x32xf32>
    tpu.vector_store %arg8[%c5_22, %c0_23], %28 {strides = array<i32>} : memref<8x32xf32, #tpu.memory_space<vmem>>, vector<1x32xf32>,
    %c6 = arith.constant 6 : index
    %30 = memref.load %arg1[%c6] : memref<8xi32, #tpu.memory_space<smem>>
    %31 = arith.index_cast %30 : i32 to index
    %c0_24 = arith.constant 0 : index
    %c0_25 = arith.constant 0 : index
    %32 = vector.load %arg2[%31, %c0_24, %c0_25] : memref<50x1x32xf32, #tpu.memory_space<vmem>>, vector<1x1x32xf32>
    %33 = vector.shape_cast %32 : vector<1x1x32xf32> to vector<1x32xf32>
    %c6_26 = arith.constant 6 : index
    %c0_27 = arith.constant 0 : index
    %34 = vector.load %arg8[%c6_26, %c0_27] : memref<8x32xf32, #tpu.memory_space<vmem>>, vector<1x32xf32>
    tpu.vector_store %arg8[%c6_26, %c0_27], %33 {strides = array<i32>} : memref<8x32xf32, #tpu.memory_space<vmem>>, vector<1x32xf32>,
    %c7 = arith.constant 7 : index
    %35 = memref.load %arg1[%c7] : memref<8xi32, #tpu.memory_space<smem>>
    %36 = arith.index_cast %35 : i32 to index
    %c0_28 = arith.constant 0 : index
    %c0_29 = arith.constant 0 : index
    %37 = vector.load %arg2[%36, %c0_28, %c0_29] : memref<50x1x32xf32, #tpu.memory_space<vmem>>, vector<1x1x32xf32>
    %38 = vector.shape_cast %37 : vector<1x1x32xf32> to vector<1x32xf32>
    %c7_30 = arith.constant 7 : index
    %c0_31 = arith.constant 0 : index
    %39 = vector.load %arg8[%c7_30, %c0_31] : memref<8x32xf32, #tpu.memory_space<vmem>>, vector<1x32xf32>
    tpu.vector_store %arg8[%c7_30, %c0_31], %38 {strides = array<i32>} : memref<8x32xf32, #tpu.memory_space<vmem>>, vector<1x32xf32>,
    %c0_32 = arith.constant 0 : index
    %c0_33 = arith.constant 0 : index
    %40 = vector.load %arg8[%c0_32, %c0_33] : memref<8x32xf32, #tpu.memory_space<vmem>>, vector<8x32xf32>
    %c0_34 = arith.constant 0 : index
    %c0_35 = arith.constant 0 : index
    %41 = vector.load %arg3[%c0_34, %c0_35] : memref<32x96xf32, #tpu.memory_space<vmem>>, vector<32x96xf32>
    %cst = arith.constant dense<0.000000e+00> : vector<8x96xf32>
    %42 = tpu.matmul %40, %41, %cst {dimension_numbers = #tpu.dot_dimension_numbers<[1], [0], [0], [1], [0, 0, 1, 1], [], []>} : vector<8x32xf32>, vector<32x96xf32>, vector<8x96xf32> -> vector<8x96xf32>
    %c0_36 = arith.constant 0 : index
    %c0_37 = arith.constant 0 : index
    %43 = vector.load %arg5[%c0_36, %c0_37] : memref<1x96xf32, #tpu.memory_space<vmem>>, vector<1x96xf32>
    %44 = vector.broadcast %43 : vector<1x96xf32> to vector<8x96xf32>
    %45 = arith.addf %42, %44 : vector<8x96xf32>
    %c0_38 = arith.constant 0 : index
    %c0_39 = arith.constant 0 : index
    %46 = vector.load %arg9[%c0_38, %c0_39] : memref<8x96xf32, #tpu.memory_space<vmem>>, vector<8x96xf32>
    tpu.vector_store %arg9[%c0_38, %c0_39], %45 {strides = array<i32>} : memref<8x96xf32, #tpu.memory_space<vmem>>, vector<8x96xf32>,
    %c0_40 = arith.constant 0 : index
    %c0_41 = arith.constant 0 : index
    %47 = vector.load %arg4[%c0_40, %c0_41] : memref<32x96xf32, #tpu.memory_space<vmem>>, vector<32x96xf32>
    %c0_42 = arith.constant 0 : index
    %c0_43 = arith.constant 0 : index
    %48 = vector.load %arg6[%c0_42, %c0_43] : memref<1x96xf32, #tpu.memory_space<vmem>>, vector<1x96xf32>
    %cst_44 = arith.constant 0.000000e+00 : f32
    %49 = vector.broadcast %cst_44 : f32 to vector<1x32xf32>
    %c0_i32 = arith.constant 0 : i32
    %c1_i32 = arith.constant 1 : i32
    %50 = arith.muli %c0_i32, %c1_i32 : i32
    %51 = arith.index_cast %50 : i32 to index
    %c0_45 = arith.constant 0 : index
    %52 = vector.load %arg9[%51, %c0_45] : memref<8x96xf32, #tpu.memory_space<vmem>>, vector<1x96xf32>
    %cst_46 = arith.constant dense<0.000000e+00> : vector<1x96xf32>
    %53 = tpu.matmul %49, %47, %cst_46 {dimension_numbers = #tpu.dot_dimension_numbers<[1], [0], [0], [1], [0, 0, 1, 1], [], []>} : vector<1x32xf32>, vector<32x96xf32>, vector<1x96xf32> -> vector<1x96xf32>
    %54 = arith.addf %53, %48 : vector<1x96xf32>
    %55 = vector.extract_strided_slice %52 {offsets = [0, 0], sizes = [1, 64], strides = [1, 1]} : vector<1x96xf32> to vector<1x64xf32>
    %56 = vector.extract_strided_slice %54 {offsets = [0, 0], sizes = [1, 64], strides = [1, 1]} : vector<1x96xf32> to vector<1x64xf32>
    %57 = arith.addf %55, %56 : vector<1x64xf32>
    %58 = arith.negf %57 : vector<1x64xf32>
    %59 = math.exp %58 : vector<1x64xf32>
    %cst_47 = arith.constant 1.000000e+00 : f32
    %60 = vector.broadcast %cst_47 : f32 to vector<1x64xf32>
    %61 = arith.addf %60, %59 : vector<1x64xf32>
    %62 = arith.divf %60, %61 : vector<1x64xf32>
    %63 = vector.extract_strided_slice %62 {offsets = [0, 0], sizes = [1, 32], strides = [1, 1]} : vector<1x64xf32> to vector<1x32xf32>
    %64 = vector.extract_strided_slice %62 {offsets = [0, 32], sizes = [1, 32], strides = [1, 1]} : vector<1x64xf32> to vector<1x32xf32>
    %65 = vector.extract_strided_slice %52 {offsets = [0, 64], sizes = [1, 32], strides = [1, 1]} : vector<1x96xf32> to vector<1x32xf32>
    %66 = vector.extract_strided_slice %54 {offsets = [0, 64], sizes = [1, 32], strides = [1, 1]} : vector<1x96xf32> to vector<1x32xf32>
    %67 = arith.mulf %63, %66 : vector<1x32xf32>
    %68 = arith.addf %65, %67 : vector<1x32xf32>
    %69 = math.tanh %68 : vector<1x32xf32>
    %70 = arith.subf %49, %69 : vector<1x32xf32>
    %71 = arith.mulf %64, %70 : vector<1x32xf32>
    %72 = arith.addf %69, %71 : vector<1x32xf32>
    %c1_i32_48 = arith.constant 1 : i32
    %73 = arith.muli %c0_i32, %c1_i32_48 : i32
    %74 = arith.index_cast %73 : i32 to index
    %c0_49 = arith.constant 0 : index
    %75 = vector.load %arg7[%74, %c0_49] : memref<8x32xf32, #tpu.memory_space<vmem>>, vector<1x32xf32>
    tpu.vector_store %arg7[%74, %c0_49], %72 {strides = array<i32>} : memref<8x32xf32, #tpu.memory_space<vmem>>, vector<1x32xf32>,
    %c1_i32_50 = arith.constant 1 : i32
    %c1_i32_51 = arith.constant 1 : i32
    %76 = arith.muli %c1_i32_50, %c1_i32_51 : i32
    %77 = arith.index_cast %76 : i32 to index
    %c0_52 = arith.constant 0 : index
    %78 = vector.load %arg9[%77, %c0_52] : memref<8x96xf32, #tpu.memory_space<vmem>>, vector<1x96xf32>
    %cst_53 = arith.constant dense<0.000000e+00> : vector<1x96xf32>
    %79 = tpu.matmul %72, %47, %cst_53 {dimension_numbers = #tpu.dot_dimension_numbers<[1], [0], [0], [1], [0, 0, 1, 1], [], []>} : vector<1x32xf32>, vector<32x96xf32>, vector<1x96xf32> -> vector<1x96xf32>
    %80 = arith.addf %79, %48 : vector<1x96xf32>
    %81 = vector.extract_strided_slice %78 {offsets = [0, 0], sizes = [1, 64], strides = [1, 1]} : vector<1x96xf32> to vector<1x64xf32>
    %82 = vector.extract_strided_slice %80 {offsets = [0, 0], sizes = [1, 64], strides = [1, 1]} : vector<1x96xf32> to vector<1x64xf32>
    %83 = arith.addf %81, %82 : vector<1x64xf32>
    %84 = arith.negf %83 : vector<1x64xf32>
    %85 = math.exp %84 : vector<1x64xf32>
    %cst_54 = arith.constant 1.000000e+00 : f32
    %86 = vector.broadcast %cst_54 : f32 to vector<1x64xf32>
    %87 = arith.addf %86, %85 : vector<1x64xf32>
    %88 = arith.divf %86, %87 : vector<1x64xf32>
    %89 = vector.extract_strided_slice %88 {offsets = [0, 0], sizes = [1, 32], strides = [1, 1]} : vector<1x64xf32> to vector<1x32xf32>
    %90 = vector.extract_strided_slice %88 {offsets = [0, 32], sizes = [1, 32], strides = [1, 1]} : vector<1x64xf32> to vector<1x32xf32>
    %91 = vector.extract_strided_slice %78 {offsets = [0, 64], sizes = [1, 32], strides = [1, 1]} : vector<1x96xf32> to vector<1x32xf32>
    %92 = vector.extract_strided_slice %80 {offsets = [0, 64], sizes = [1, 32], strides = [1, 1]} : vector<1x96xf32> to vector<1x32xf32>
    %93 = arith.mulf %89, %92 : vector<1x32xf32>
    %94 = arith.addf %91, %93 : vector<1x32xf32>
    %95 = math.tanh %94 : vector<1x32xf32>
    %96 = arith.subf %72, %95 : vector<1x32xf32>
    %97 = arith.mulf %90, %96 : vector<1x32xf32>
    %98 = arith.addf %95, %97 : vector<1x32xf32>
    %c1_i32_55 = arith.constant 1 : i32
    %99 = arith.muli %c1_i32_50, %c1_i32_55 : i32
    %100 = arith.index_cast %99 : i32 to index
    %c0_56 = arith.constant 0 : index
    %101 = vector.load %arg7[%100, %c0_56] : memref<8x32xf32, #tpu.memory_space<vmem>>, vector<1x32xf32>
    tpu.vector_store %arg7[%100, %c0_56], %98 {strides = array<i32>} : memref<8x32xf32, #tpu.memory_space<vmem>>, vector<1x32xf32>,
    %c2_i32 = arith.constant 2 : i32
    %c1_i32_57 = arith.constant 1 : i32
    %102 = arith.muli %c2_i32, %c1_i32_57 : i32
    %103 = arith.index_cast %102 : i32 to index
    %c0_58 = arith.constant 0 : index
    %104 = vector.load %arg9[%103, %c0_58] : memref<8x96xf32, #tpu.memory_space<vmem>>, vector<1x96xf32>
    %cst_59 = arith.constant dense<0.000000e+00> : vector<1x96xf32>
    %105 = tpu.matmul %98, %47, %cst_59 {dimension_numbers = #tpu.dot_dimension_numbers<[1], [0], [0], [1], [0, 0, 1, 1], [], []>} : vector<1x32xf32>, vector<32x96xf32>, vector<1x96xf32> -> vector<1x96xf32>
    %106 = arith.addf %105, %48 : vector<1x96xf32>
    %107 = vector.extract_strided_slice %104 {offsets = [0, 0], sizes = [1, 64], strides = [1, 1]} : vector<1x96xf32> to vector<1x64xf32>
    %108 = vector.extract_strided_slice %106 {offsets = [0, 0], sizes = [1, 64], strides = [1, 1]} : vector<1x96xf32> to vector<1x64xf32>
    %109 = arith.addf %107, %108 : vector<1x64xf32>
    %110 = arith.negf %109 : vector<1x64xf32>
    %111 = math.exp %110 : vector<1x64xf32>
    %cst_60 = arith.constant 1.000000e+00 : f32
    %112 = vector.broadcast %cst_60 : f32 to vector<1x64xf32>
    %113 = arith.addf %112, %111 : vector<1x64xf32>
    %114 = arith.divf %112, %113 : vector<1x64xf32>
    %115 = vector.extract_strided_slice %114 {offsets = [0, 0], sizes = [1, 32], strides = [1, 1]} : vector<1x64xf32> to vector<1x32xf32>
    %116 = vector.extract_strided_slice %114 {offsets = [0, 32], sizes = [1, 32], strides = [1, 1]} : vector<1x64xf32> to vector<1x32xf32>
    %117 = vector.extract_strided_slice %104 {offsets = [0, 64], sizes = [1, 32], strides = [1, 1]} : vector<1x96xf32> to vector<1x32xf32>
    %118 = vector.extract_strided_slice %106 {offsets = [0, 64], sizes = [1, 32], strides = [1, 1]} : vector<1x96xf32> to vector<1x32xf32>
    %119 = arith.mulf %115, %118 : vector<1x32xf32>
    %120 = arith.addf %117, %119 : vector<1x32xf32>
    %121 = math.tanh %120 : vector<1x32xf32>
    %122 = arith.subf %98, %121 : vector<1x32xf32>
    %123 = arith.mulf %116, %122 : vector<1x32xf32>
    %124 = arith.addf %121, %123 : vector<1x32xf32>
    %c1_i32_61 = arith.constant 1 : i32
    %125 = arith.muli %c2_i32, %c1_i32_61 : i32
    %126 = arith.index_cast %125 : i32 to index
    %c0_62 = arith.constant 0 : index
    %127 = vector.load %arg7[%126, %c0_62] : memref<8x32xf32, #tpu.memory_space<vmem>>, vector<1x32xf32>
    tpu.vector_store %arg7[%126, %c0_62], %124 {strides = array<i32>} : memref<8x32xf32, #tpu.memory_space<vmem>>, vector<1x32xf32>,
    %c3_i32 = arith.constant 3 : i32
    %c1_i32_63 = arith.constant 1 : i32
    %128 = arith.muli %c3_i32, %c1_i32_63 : i32
    %129 = arith.index_cast %128 : i32 to index
    %c0_64 = arith.constant 0 : index
    %130 = vector.load %arg9[%129, %c0_64] : memref<8x96xf32, #tpu.memory_space<vmem>>, vector<1x96xf32>
    %cst_65 = arith.constant dense<0.000000e+00> : vector<1x96xf32>
    %131 = tpu.matmul %124, %47, %cst_65 {dimension_numbers = #tpu.dot_dimension_numbers<[1], [0], [0], [1], [0, 0, 1, 1], [], []>} : vector<1x32xf32>, vector<32x96xf32>, vector<1x96xf32> -> vector<1x96xf32>
    %132 = arith.addf %131, %48 : vector<1x96xf32>
    %133 = vector.extract_strided_slice %130 {offsets = [0, 0], sizes = [1, 64], strides = [1, 1]} : vector<1x96xf32> to vector<1x64xf32>
    %134 = vector.extract_strided_slice %132 {offsets = [0, 0], sizes = [1, 64], strides = [1, 1]} : vector<1x96xf32> to vector<1x64xf32>
    %135 = arith.addf %133, %134 : vector<1x64xf32>
    %136 = arith.negf %135 : vector<1x64xf32>
    %137 = math.exp %136 : vector<1x64xf32>
    %cst_66 = arith.constant 1.000000e+00 : f32
    %138 = vector.broadcast %cst_66 : f32 to vector<1x64xf32>
    %139 = arith.addf %138, %137 : vector<1x64xf32>
    %140 = arith.divf %138, %139 : vector<1x64xf32>
    %141 = vector.extract_strided_slice %140 {offsets = [0, 0], sizes = [1, 32], strides = [1, 1]} : vector<1x64xf32> to vector<1x32xf32>
    %142 = vector.extract_strided_slice %140 {offsets = [0, 32], sizes = [1, 32], strides = [1, 1]} : vector<1x64xf32> to vector<1x32xf32>
    %143 = vector.extract_strided_slice %130 {offsets = [0, 64], sizes = [1, 32], strides = [1, 1]} : vector<1x96xf32> to vector<1x32xf32>
    %144 = vector.extract_strided_slice %132 {offsets = [0, 64], sizes = [1, 32], strides = [1, 1]} : vector<1x96xf32> to vector<1x32xf32>
    %145 = arith.mulf %141, %144 : vector<1x32xf32>
    %146 = arith.addf %143, %145 : vector<1x32xf32>
    %147 = math.tanh %146 : vector<1x32xf32>
    %148 = arith.subf %124, %147 : vector<1x32xf32>
    %149 = arith.mulf %142, %148 : vector<1x32xf32>
    %150 = arith.addf %147, %149 : vector<1x32xf32>
    %c1_i32_67 = arith.constant 1 : i32
    %151 = arith.muli %c3_i32, %c1_i32_67 : i32
    %152 = arith.index_cast %151 : i32 to index
    %c0_68 = arith.constant 0 : index
    %153 = vector.load %arg7[%152, %c0_68] : memref<8x32xf32, #tpu.memory_space<vmem>>, vector<1x32xf32>
    tpu.vector_store %arg7[%152, %c0_68], %150 {strides = array<i32>} : memref<8x32xf32, #tpu.memory_space<vmem>>, vector<1x32xf32>,
    %c4_i32 = arith.constant 4 : i32
    %c1_i32_69 = arith.constant 1 : i32
    %154 = arith.muli %c4_i32, %c1_i32_69 : i32
    %155 = arith.index_cast %154 : i32 to index
    %c0_70 = arith.constant 0 : index
    %156 = vector.load %arg9[%155, %c0_70] : memref<8x96xf32, #tpu.memory_space<vmem>>, vector<1x96xf32>
    %cst_71 = arith.constant dense<0.000000e+00> : vector<1x96xf32>
    %157 = tpu.matmul %150, %47, %cst_71 {dimension_numbers = #tpu.dot_dimension_numbers<[1], [0], [0], [1], [0, 0, 1, 1], [], []>} : vector<1x32xf32>, vector<32x96xf32>, vector<1x96xf32> -> vector<1x96xf32>
    %158 = arith.addf %157, %48 : vector<1x96xf32>
    %159 = vector.extract_strided_slice %156 {offsets = [0, 0], sizes = [1, 64], strides = [1, 1]} : vector<1x96xf32> to vector<1x64xf32>
    %160 = vector.extract_strided_slice %158 {offsets = [0, 0], sizes = [1, 64], strides = [1, 1]} : vector<1x96xf32> to vector<1x64xf32>
    %161 = arith.addf %159, %160 : vector<1x64xf32>
    %162 = arith.negf %161 : vector<1x64xf32>
    %163 = math.exp %162 : vector<1x64xf32>
    %cst_72 = arith.constant 1.000000e+00 : f32
    %164 = vector.broadcast %cst_72 : f32 to vector<1x64xf32>
    %165 = arith.addf %164, %163 : vector<1x64xf32>
    %166 = arith.divf %164, %165 : vector<1x64xf32>
    %167 = vector.extract_strided_slice %166 {offsets = [0, 0], sizes = [1, 32], strides = [1, 1]} : vector<1x64xf32> to vector<1x32xf32>
    %168 = vector.extract_strided_slice %166 {offsets = [0, 32], sizes = [1, 32], strides = [1, 1]} : vector<1x64xf32> to vector<1x32xf32>
    %169 = vector.extract_strided_slice %156 {offsets = [0, 64], sizes = [1, 32], strides = [1, 1]} : vector<1x96xf32> to vector<1x32xf32>
    %170 = vector.extract_strided_slice %158 {offsets = [0, 64], sizes = [1, 32], strides = [1, 1]} : vector<1x96xf32> to vector<1x32xf32>
    %171 = arith.mulf %167, %170 : vector<1x32xf32>
    %172 = arith.addf %169, %171 : vector<1x32xf32>
    %173 = math.tanh %172 : vector<1x32xf32>
    %174 = arith.subf %150, %173 : vector<1x32xf32>
    %175 = arith.mulf %168, %174 : vector<1x32xf32>
    %176 = arith.addf %173, %175 : vector<1x32xf32>
    %c1_i32_73 = arith.constant 1 : i32
    %177 = arith.muli %c4_i32, %c1_i32_73 : i32
    %178 = arith.index_cast %177 : i32 to index
    %c0_74 = arith.constant 0 : index
    %179 = vector.load %arg7[%178, %c0_74] : memref<8x32xf32, #tpu.memory_space<vmem>>, vector<1x32xf32>
    tpu.vector_store %arg7[%178, %c0_74], %176 {strides = array<i32>} : memref<8x32xf32, #tpu.memory_space<vmem>>, vector<1x32xf32>,
    %c5_i32 = arith.constant 5 : i32
    %c1_i32_75 = arith.constant 1 : i32
    %180 = arith.muli %c5_i32, %c1_i32_75 : i32
    %181 = arith.index_cast %180 : i32 to index
    %c0_76 = arith.constant 0 : index
    %182 = vector.load %arg9[%181, %c0_76] : memref<8x96xf32, #tpu.memory_space<vmem>>, vector<1x96xf32>
    %cst_77 = arith.constant dense<0.000000e+00> : vector<1x96xf32>
    %183 = tpu.matmul %176, %47, %cst_77 {dimension_numbers = #tpu.dot_dimension_numbers<[1], [0], [0], [1], [0, 0, 1, 1], [], []>} : vector<1x32xf32>, vector<32x96xf32>, vector<1x96xf32> -> vector<1x96xf32>
    %184 = arith.addf %183, %48 : vector<1x96xf32>
    %185 = vector.extract_strided_slice %182 {offsets = [0, 0], sizes = [1, 64], strides = [1, 1]} : vector<1x96xf32> to vector<1x64xf32>
    %186 = vector.extract_strided_slice %184 {offsets = [0, 0], sizes = [1, 64], strides = [1, 1]} : vector<1x96xf32> to vector<1x64xf32>
    %187 = arith.addf %185, %186 : vector<1x64xf32>
    %188 = arith.negf %187 : vector<1x64xf32>
    %189 = math.exp %188 : vector<1x64xf32>
    %cst_78 = arith.constant 1.000000e+00 : f32
    %190 = vector.broadcast %cst_78 : f32 to vector<1x64xf32>
    %191 = arith.addf %190, %189 : vector<1x64xf32>
    %192 = arith.divf %190, %191 : vector<1x64xf32>
    %193 = vector.extract_strided_slice %192 {offsets = [0, 0], sizes = [1, 32], strides = [1, 1]} : vector<1x64xf32> to vector<1x32xf32>
    %194 = vector.extract_strided_slice %192 {offsets = [0, 32], sizes = [1, 32], strides = [1, 1]} : vector<1x64xf32> to vector<1x32xf32>
    %195 = vector.extract_strided_slice %182 {offsets = [0, 64], sizes = [1, 32], strides = [1, 1]} : vector<1x96xf32> to vector<1x32xf32>
    %196 = vector.extract_strided_slice %184 {offsets = [0, 64], sizes = [1, 32], strides = [1, 1]} : vector<1x96xf32> to vector<1x32xf32>
    %197 = arith.mulf %193, %196 : vector<1x32xf32>
    %198 = arith.addf %195, %197 : vector<1x32xf32>
    %199 = math.tanh %198 : vector<1x32xf32>
    %200 = arith.subf %176, %199 : vector<1x32xf32>
    %201 = arith.mulf %194, %200 : vector<1x32xf32>
    %202 = arith.addf %199, %201 : vector<1x32xf32>
    %c1_i32_79 = arith.constant 1 : i32
    %203 = arith.muli %c5_i32, %c1_i32_79 : i32
    %204 = arith.index_cast %203 : i32 to index
    %c0_80 = arith.constant 0 : index
    %205 = vector.load %arg7[%204, %c0_80] : memref<8x32xf32, #tpu.memory_space<vmem>>, vector<1x32xf32>
    tpu.vector_store %arg7[%204, %c0_80], %202 {strides = array<i32>} : memref<8x32xf32, #tpu.memory_space<vmem>>, vector<1x32xf32>,
    %c6_i32 = arith.constant 6 : i32
    %c1_i32_81 = arith.constant 1 : i32
    %206 = arith.muli %c6_i32, %c1_i32_81 : i32
    %207 = arith.index_cast %206 : i32 to index
    %c0_82 = arith.constant 0 : index
    %208 = vector.load %arg9[%207, %c0_82] : memref<8x96xf32, #tpu.memory_space<vmem>>, vector<1x96xf32>
    %cst_83 = arith.constant dense<0.000000e+00> : vector<1x96xf32>
    %209 = tpu.matmul %202, %47, %cst_83 {dimension_numbers = #tpu.dot_dimension_numbers<[1], [0], [0], [1], [0, 0, 1, 1], [], []>} : vector<1x32xf32>, vector<32x96xf32>, vector<1x96xf32> -> vector<1x96xf32>
    %210 = arith.addf %209, %48 : vector<1x96xf32>
    %211 = vector.extract_strided_slice %208 {offsets = [0, 0], sizes = [1, 64], strides = [1, 1]} : vector<1x96xf32> to vector<1x64xf32>
    %212 = vector.extract_strided_slice %210 {offsets = [0, 0], sizes = [1, 64], strides = [1, 1]} : vector<1x96xf32> to vector<1x64xf32>
    %213 = arith.addf %211, %212 : vector<1x64xf32>
    %214 = arith.negf %213 : vector<1x64xf32>
    %215 = math.exp %214 : vector<1x64xf32>
    %cst_84 = arith.constant 1.000000e+00 : f32
    %216 = vector.broadcast %cst_84 : f32 to vector<1x64xf32>
    %217 = arith.addf %216, %215 : vector<1x64xf32>
    %218 = arith.divf %216, %217 : vector<1x64xf32>
    %219 = vector.extract_strided_slice %218 {offsets = [0, 0], sizes = [1, 32], strides = [1, 1]} : vector<1x64xf32> to vector<1x32xf32>
    %220 = vector.extract_strided_slice %218 {offsets = [0, 32], sizes = [1, 32], strides = [1, 1]} : vector<1x64xf32> to vector<1x32xf32>
    %221 = vector.extract_strided_slice %208 {offsets = [0, 64], sizes = [1, 32], strides = [1, 1]} : vector<1x96xf32> to vector<1x32xf32>
    %222 = vector.extract_strided_slice %210 {offsets = [0, 64], sizes = [1, 32], strides = [1, 1]} : vector<1x96xf32> to vector<1x32xf32>
    %223 = arith.mulf %219, %222 : vector<1x32xf32>
    %224 = arith.addf %221, %223 : vector<1x32xf32>
    %225 = math.tanh %224 : vector<1x32xf32>
    %226 = arith.subf %202, %225 : vector<1x32xf32>
    %227 = arith.mulf %220, %226 : vector<1x32xf32>
    %228 = arith.addf %225, %227 : vector<1x32xf32>
    %c1_i32_85 = arith.constant 1 : i32
    %229 = arith.muli %c6_i32, %c1_i32_85 : i32
    %230 = arith.index_cast %229 : i32 to index
    %c0_86 = arith.constant 0 : index
    %231 = vector.load %arg7[%230, %c0_86] : memref<8x32xf32, #tpu.memory_space<vmem>>, vector<1x32xf32>
    tpu.vector_store %arg7[%230, %c0_86], %228 {strides = array<i32>} : memref<8x32xf32, #tpu.memory_space<vmem>>, vector<1x32xf32>,
    %c7_i32 = arith.constant 7 : i32
    %c1_i32_87 = arith.constant 1 : i32
    %232 = arith.muli %c7_i32, %c1_i32_87 : i32
    %233 = arith.index_cast %232 : i32 to index
    %c0_88 = arith.constant 0 : index
    %234 = vector.load %arg9[%233, %c0_88] : memref<8x96xf32, #tpu.memory_space<vmem>>, vector<1x96xf32>
    %cst_89 = arith.constant dense<0.000000e+00> : vector<1x96xf32>
    %235 = tpu.matmul %228, %47, %cst_89 {dimension_numbers = #tpu.dot_dimension_numbers<[1], [0], [0], [1], [0, 0, 1, 1], [], []>} : vector<1x32xf32>, vector<32x96xf32>, vector<1x96xf32> -> vector<1x96xf32>
    %236 = arith.addf %235, %48 : vector<1x96xf32>
    %237 = vector.extract_strided_slice %234 {offsets = [0, 0], sizes = [1, 64], strides = [1, 1]} : vector<1x96xf32> to vector<1x64xf32>
    %238 = vector.extract_strided_slice %236 {offsets = [0, 0], sizes = [1, 64], strides = [1, 1]} : vector<1x96xf32> to vector<1x64xf32>
    %239 = arith.addf %237, %238 : vector<1x64xf32>
    %240 = arith.negf %239 : vector<1x64xf32>
    %241 = math.exp %240 : vector<1x64xf32>
    %cst_90 = arith.constant 1.000000e+00 : f32
    %242 = vector.broadcast %cst_90 : f32 to vector<1x64xf32>
    %243 = arith.addf %242, %241 : vector<1x64xf32>
    %244 = arith.divf %242, %243 : vector<1x64xf32>
    %245 = vector.extract_strided_slice %244 {offsets = [0, 0], sizes = [1, 32], strides = [1, 1]} : vector<1x64xf32> to vector<1x32xf32>
    %246 = vector.extract_strided_slice %244 {offsets = [0, 32], sizes = [1, 32], strides = [1, 1]} : vector<1x64xf32> to vector<1x32xf32>
    %247 = vector.extract_strided_slice %234 {offsets = [0, 64], sizes = [1, 32], strides = [1, 1]} : vector<1x96xf32> to vector<1x32xf32>
    %248 = vector.extract_strided_slice %236 {offsets = [0, 64], sizes = [1, 32], strides = [1, 1]} : vector<1x96xf32> to vector<1x32xf32>
    %249 = arith.mulf %245, %248 : vector<1x32xf32>
    %250 = arith.addf %247, %249 : vector<1x32xf32>
    %251 = math.tanh %250 : vector<1x32xf32>
    %252 = arith.subf %228, %251 : vector<1x32xf32>
    %253 = arith.mulf %246, %252 : vector<1x32xf32>
    %254 = arith.addf %251, %253 : vector<1x32xf32>
    %c1_i32_91 = arith.constant 1 : i32
    %255 = arith.muli %c7_i32, %c1_i32_91 : i32
    %256 = arith.index_cast %255 : i32 to index
    %c0_92 = arith.constant 0 : index
    %257 = vector.load %arg7[%256, %c0_92] : memref<8x32xf32, #tpu.memory_space<vmem>>, vector<1x32xf32>
    tpu.vector_store %arg7[%256, %c0_92], %254 {strides = array<i32>} : memref<8x32xf32, #tpu.memory_space<vmem>>, vector<1x32xf32>,
    %c8_i32 = arith.constant 8 : i32
    return
  }
  func.func @transform_0(%arg0: i32, %arg1: memref<8xi32, #tpu.memory_space<smem>>) -> (i32, i32, i32) {
    %c0_i32 = arith.constant 0 : i32
    %c0_i32_0 = arith.constant 0 : i32
    %c0_i32_1 = arith.constant 0 : i32
    %c0_i32_2 = arith.constant 0 : i32
    return %c0_i32, %c0_i32_0, %c0_i32_1 : i32, i32, i32
  }
  func.func @transform_1(%arg0: i32, %arg1: memref<8xi32, #tpu.memory_space<smem>>) -> (i32, i32) {
    %c0_i32 = arith.constant 0 : i32
    %c0_i32_0 = arith.constant 0 : i32
    %c0_i32_1 = arith.constant 0 : i32
    return %c0_i32, %c0_i32_0 : i32, i32
  }
  func.func @transform_2(%arg0: i32, %arg1: memref<8xi32, #tpu.memory_space<smem>>) -> (i32, i32) {
    %c0_i32 = arith.constant 0 : i32
    %c0_i32_0 = arith.constant 0 : i32
    %c0_i32_1 = arith.constant 0 : i32
    return %c0_i32, %c0_i32_0 : i32, i32
  }
  func.func @transform_3(%arg0: i32, %arg1: memref<8xi32, #tpu.memory_space<smem>>) -> (i32, i32) {
    %c0_i32 = arith.constant 0 : i32
    %c0_i32_0 = arith.constant 0 : i32
    %c0_i32_1 = arith.constant 0 : i32
    return %c0_i32, %c0_i32_0 : i32, i32
  }
  func.func @transform_4(%arg0: i32, %arg1: memref<8xi32, #tpu.memory_space<smem>>) -> (i32, i32) {
    %c0_i32 = arith.constant 0 : i32
    %c0_i32_0 = arith.constant 0 : i32
    %c0_i32_1 = arith.constant 0 : i32
    return %c0_i32, %c0_i32_0 : i32, i32
  }
  func.func @transform_5(%arg0: i32, %arg1: memref<8xi32, #tpu.memory_space<smem>>) -> (i32, i32) {
    %c0_i32 = arith.constant 0 : i32
    %c0_i32_0 = arith.constant 0 : i32
    %c0_i32_1 = arith.constant 0 : i32
    return %c0_i32, %c0_i32_0 : i32, i32
  }
}

</mosaic_0001>

<bundles_post_ra>
// kernel: encoder_gru_forward.1
= control target key start
LH: loop header
LB: loop body
LE: loop exit
PB: predicated region body
PF: predicated region fallthrough
CT: control target
= control target key end

     0   :  { %s1595_s0 = inlined_call_operand.vmem [shape: s32[8], index: 0, kind: input, shape index: {}]   ;;  %s1596_s1 = inlined_call_operand.vmem [shape: f32[50,1,32], index: 1, kind: input, shape index: {}]   ;;  %s1597_s2 = inlined_call_operand.vmem [shape: f32[32,96], index: 2, kind: input, shape index: {}]   ;;  %s1598_s3 = inlined_call_operand.vmem [shape: f32[32,96], index: 3, kind: input, shape index: {}]   ;;  %s1599_s4 = inlined_call_operand.vmem [shape: f32[1,96], index: 4, kind: input, shape index: {}]   ;;  %s1600_s5 = inlined_call_operand.vmem [shape: f32[1,96], index: 5, kind: input, shape index: {}]   ;;  %s1601_s6 = inlined_call_operand.hbm [shape: f32[8,32], index: 6, kind: output, shape index: {}]  }
   0x1   :  { %s11_s23 = sshll.u32 %s1595_s0, 4  ;;  %s12_s23 = int_to_ptr.vmem [resolvable:$true] %s11_s23 }
   0x2   :  { %s1311_s24 = scalar_lea.vmem %s12_s23, 16  ;;  %p1316_p1 = scmp.lt.s32.totalorder %s12_s23, %s12_s23 }
   0x3   :  { %p1312_p0 = scmp.ne.s32.totalorder %s12_s23, %s1311_s24  ;;  %p1317_p2 = scmp.lt.s32.totalorder %s1311_s24, %s1311_s24 }
   0x5   :  { %p1318_p3 = por %p1317_p2, %p1316_p1 }
   0x7   :  { %p1319_p4 = pnand %p1318_p3, %p1312_p0 }
   0x9   :  { %1322 = shalt.err (!%p1319_p4)  }
   0xa   :  { %s1349_s25 = smov [#allocation5]  }
   0xb   :  { %14 = dma.vmem_to_smem %s12_s23, 16, %s1349_s25, [#allocation4] }
   0xc   :  { %1345 = dma.done.wait [#allocation4], 16 }
   0xd   :  { %1346 = vsyncadd [#allocation4], 4294967280 }
   0xe   :  { %16 = sfence }
   0xf   :  { %v149_v0 = vld [vmem:[%s1598_s3] sm:$0xff]  ;;  %v150_v1 = vld [vmem:[%s1598_s3 + $0x8] sm:$0xff]  ;;  %v151_v2 = vld [vmem:[%s1598_s3 + $0x10] sm:$0xff]  ;;  %v1350_v3 = vmov 0.0|0.0   ;;  %s28_s13 = sld [smem:[#allocation5]]  ;;  %vm1351_vm0 = vmmov 0  }
  0x10   :  { %1207 = vmatprep.subr.bf16.mxu1 %v1350_v3  ;;  %v1405_v4 = vpack.c.bf16 %v150_v1, %v149_v0  ;;  %v152_v5 = vld [vmem:[%s1598_s3 + $0x18] sm:$0xff]  ;;  %1201 = vmatprep.subr.bf16.mxu0 %v1350_v3  ;;  %v62_v6 = vld [vmem:[%s1597_s2] sm:$0xff]  ;;  %v63_v7 = vld [vmem:[%s1597_s2 + $0x8] sm:$0xff]  ;;  %v1352_v9 = vmov 0.0   ;;  %s1033_s17 = sld [smem:[#allocation5 + $0x1]]  ;;  %s1034_s18 = sld [smem:[#allocation5 + $0x2]] }
  0x11   :  { %v1202_v8 = vpack.c.bf16 %v63_v7, %v62_v6  ;;  %1121 = vmatprep.mubr.msk.f32.mxu1 %vm1351_vm0, %v1352_v9  ;;  %v64_v10 = vld [vmem:[%s1597_s2 + $0x10] sm:$0xff]  ;;  %v65_v11 = vld [vmem:[%s1597_s2 + $0x18] sm:$0xff]  ;;  %1110 = vmatprep.mubr.msk.f32.mxu0 %vm1351_vm0, %v1352_v9  ;;  %v1428_v12 = vpack.c.bf16 %v152_v5, %v151_v2  ;;  %s1035_s19 = sld [smem:[#allocation5 + $0x3]]  ;;  %s1036_s20 = sld [smem:[#allocation5 + $0x4]] }
  0x12   :  { %1209 = vmatpush3.bf16.msra.mxu1 %v1405_v4  ;;  %v1205_v13 = vpack.c.bf16 %v65_v11, %v64_v10  ;;  %s1037_s21 = sld [smem:[#allocation5 + $0x5]]  ;;  %s1038_s22 = sld [smem:[#allocation5 + $0x6]] }
  0x13   :  { %1210 = vmatprep.subr.bf16.mxu1 %v1350_v3  ;;  %1203 = vmatpush3.bf16.msra.mxu0 %v1202_v8  ;;  %s1432_s2 = sld [smem:[#allocation5 + $0x7]] }
  0x14   :  { %1204 = vmatprep.subr.bf16.mxu0 %v1350_v3 }
  0x15   :  { %17 = vsyncpa [#allocation7], 0  ;;  %vm31_vm1 = vcmask 253952   ;;  %s29_s25 = scalar_lea.vmem %s1596_s1, %s28_s13  ;;  %vm73_vm2 = vcmask 261120   ;;  %v1487_v23 = vld [vmem:[%s1600_s5] sm:$0x1] }
  0x16   :  { %1212 = vmatpush3.bf16.msra.mxu1 %v1428_v12  ;;  %v30_v14 = vld [vmem:[%s29_s25] sm:$0x1]  ;;  %s34_s28 = scalar_lea.vmem %s1596_s1, %s1033_s17  ;;  %s38_s30 = scalar_lea.vmem %s1596_s1, %s1034_s18  ;;  %vm147_vm3 = vcmask 785408  }
  0x17   :  { %1206 = vmatpush3.bf16.msra.mxu0 %v1205_v13  ;;  %1219 = vmatprep.subr.bf16.mxu1 %v1350_v3  ;;  %32 = vst.msk [vmem:[#allocation2] sm:$0x1] %vm31_vm1, %v30_v14  ;;  %v35_v15 = vld [vmem:[%s34_s28] sm:$0x1]  ;;  %s42_s9 = scalar_lea.vmem %s1596_s1, %s1035_s19  ;;  %s46_s12 = scalar_lea.vmem %s1596_s1, %s1036_s20 }
  0x18   :  { %v39_v16 = vld [vmem:[%s38_s30] sm:$0x1]  ;;  %1213 = vmatprep.subr.bf16.mxu0 %v1350_v3  ;;  %36 = vst.msk [vmem:[#allocation2 + $0x1] sm:$0x1] %vm31_vm1, %v35_v15  ;;  %s50_s15 = scalar_lea.vmem %s1596_s1, %s1037_s21  ;;  %s54_s17 = scalar_lea.vmem %s1596_s1, %s1038_s22 }
  0x19   :  { %1122 = vmatmul.mubr.f32.vlgmr.msra.gmra.mrb[0].mxu1 %v1352_v9  ;;  %40 = vst.msk [vmem:[#allocation2 + $0x2] sm:$0x1] %vm31_vm1, %v39_v16  ;;  %v43_v17 = vld [vmem:[%s42_s9] sm:$0x1]  ;;  %s58_s20 = scalar_lea.vmem %s1596_s1, %s1432_s2  ;;  %s1353_s22 = smov 64  }
  0x1a   :  { %v47_v18 = vld [vmem:[%s46_s12] sm:$0x1]  ;;  %44 = vst.msk [vmem:[#allocation2 + $0x3] sm:$0x1] %vm31_vm1, %v43_v17  ;;  %1221 = vmatpush3.bf16.msra.mxu1 %v1405_v4  ;;  %1143 = vmatprep.mubr.msk.f32.mxu1 %vm1351_vm0, %v1352_v9  ;;  %s1355_s5 = smov 32   ;;  %s1356_s24 = smov [#allocation6]  }
  0x1b   :  { %48 = vst.msk [vmem:[#allocation2 + $0x4] sm:$0x1] %vm31_vm1, %v47_v18  ;;  %v51_v19 = vld [vmem:[%s50_s15] sm:$0x1]  ;;  %1222 = vmatprep.subr.bf16.mxu1 %v1350_v3  ;;  %s1017_s25 = sshll.u32 %s1356_s24, 4  ;;  %s1018_s25 = int_to_ptr.vmem [resolvable:$true] %s1017_s25 }
  0x1c   :  { %v55_v20 = vld [vmem:[%s54_s17] sm:$0x1]  ;;  %52 = vst.msk [vmem:[#allocation2 + $0x5] sm:$0x1] %vm31_vm1, %v51_v19  ;;  %s1323_s26 = scalar_lea.vmem %s1018_s25, 128  ;;  %p1328_p6 = scmp.lt.s32.totalorder %s1018_s25, %s1018_s25 }
  0x1d   :  { %56 = vst.msk [vmem:[#allocation2 + $0x6] sm:$0x1] %vm31_vm1, %v55_v20  ;;  %v59_v21 = vld [vmem:[%s58_s20] sm:$0x1]  ;;  %p1324_p5 = scmp.ne.s32.totalorder %s1018_s25, %s1323_s26  ;;  %p1329_p7 = scmp.lt.s32.totalorder %s1323_s26, %s1323_s26 }
  0x1e   :  { %60 = vst.msk [vmem:[#allocation2 + $0x7] sm:$0x1] %vm31_vm1, %v59_v21  ;;  %1224 = vmatpush3.bf16.msra.mxu1 %v1428_v12  ;;  %v1040_v27 = vld [vmem:[%s1599_s4] ss:$0 sm:$0xff]  ;;  %s1354_s4 = smov 96  }
  0x1f   :  { %1231 = vmatprep.subr.bf16.mxu1 %v1350_v3  ;;  %p1330_p8 = por %p1329_p7, %p1328_p6 }
  0x21   :  { %p1331_p9 = pnand %p1330_p8, %p1324_p5 }
  0x25   :  { %v61_v22 = vld [vmem:[#allocation2] sm:$0xff] }
  0x26   :  { %1111 = vmatmul.mubr.msk.f32.vlgmr.msra.gmra.mrb[0].mxu0 %vm73_vm2, %v61_v22 }
  0x27   :  { %1215 = vmatpush3.bf16.msra.mxu0 %v1405_v4  ;;  %1132 = vmatprep.mubr.msk.f32.mxu0 %vm1351_vm0, %v1352_v9 }
  0x28   :  { %1216 = vmatprep.subr.bf16.mxu0 %v1350_v3 }
  0x2b   :  { %1218 = vmatpush3.bf16.msra.mxu0 %v1428_v12 }
  0x2c   :  { %1225 = vmatprep.subr.bf16.mxu0 %v1350_v3 }
  0xec   :  { %v224_v24 = vpop.f32.mrb[0].mxu1 }
  0xed   :  { %v225_v25 = vadd.f32 %v224_v24, %v1487_v23  ;;  %v1123_v26 = vpop.f32.mrb[1].mxu1 }
  0xef   :  { %236 = vrot.lane.b32.xlu0 %v225_v25, %s1353_s22 }
  0xf9   :  { %v143_v28 = vpop.f32.mrb[0].mxu0 }
  0xfa   :  { %v144_v29 = vadd.f32 %v1040_v27, %v143_v28  ;;  %v1112_v30 = vpop.f32.mrb[1].mxu0 }
  0xfc   :  { %148 = vst.msk [vmem:[#allocation3] sm:$0xff] %vm147_vm3, %v144_v29 }
 0x103   :  { %v154_v31 = vld [vmem:[#allocation3] sm:$0x1]  ;;  %v262_v51 = vld [vmem:[#allocation3 + $0x1] sm:$0x1]  ;;  %v369_v10 = vld [vmem:[#allocation3 + $0x2] sm:$0x1] }
 0x104   :  { %v228_v32 = vadd.f32 %v225_v25, %v154_v31 }
 0x106   :  { %v1042_v33 = vmul.f32 -1.442695, %v228_v32  ;;  %v476_v32 = vld [vmem:[#allocation3 + $0x3] sm:$0x1] }
 0x108   :  { %1263 = vpow2.f32 %v1042_v33 }
 0x112   :  { %v1264_v34 = vpop.eup %1263 }
 0x113   :  { %v232_v35 = vadd.f32 1.0, %v1264_v34 }
 0x115   :  { %1265 = vrcp.f32 %v232_v35 }
 0x11f   :  { %v1266_v36 = vpop.eup %1265 }
 0x161   :  { %v237_v37 = vpop.permute.xlu0 %236 }
 0x162   :  { %v239_v38 = vmul.f32 %v1266_v36, %v237_v37 }
 0x164   :  { %241 = vrot.lane.b32.xlu0 %v239_v38, %s1353_s22 }
 0x1d6   :  { %v242_v39 = vpop.permute.xlu0 %241 }
 0x1d7   :  { %v244_v40 = vadd.f32 %v242_v39, %v154_v31 }
 0x1d9   :  { %1267 = vtanh.f32 %v244_v40 }
 0x1e3   :  { %v1268_v41 = vpop.eup %1267 }
 0x1e4   :  { %v246_v42 = vsub.f32 0.0, %v1268_v41 }
 0x1e6   :  { %248 = vrot.lane.b32.xlu1 %v246_v42, %s1354_s4 }
 0x258   :  { %v249_v43 = vpop.permute.xlu1 %248 }
 0x259   :  { %v251_v44 = vmul.f32 %v1266_v36, %v249_v43 }
 0x25b   :  { %253 = vrot.lane.b32.xlu1 %v251_v44, %s1355_s5 }
 0x2cd   :  { %v254_v45 = vpop.permute.xlu1 %253 }
 0x2ce   :  { %v256_v46 = vadd.f32 %v1268_v41, %v254_v45 }
 0x2d0   :  { %258 = vrot.lane.b32.xlu0 %v256_v46, %s1353_s22 }
 0x342   :  { %v259_v47 = vpop.permute.xlu0 %258 }
 0x343   :  { %261 = vst.msk [vmem:[#allocation6] sm:$0x1] %vm31_vm1, %v259_v47  ;;  %1133 = vmatmul.mubr.msk.f32.vlgmr.msra.gmra.mrb[2].mxu0 %vm73_vm2, %v259_v47 }
 0x344   :  { %1227 = vmatpush3.bf16.msra.mxu0 %v1405_v4  ;;  %1154 = vmatprep.mubr.msk.f32.mxu0 %vm1351_vm0, %v1352_v9 }
 0x345   :  { %1228 = vmatprep.subr.bf16.mxu0 %v1350_v3 }
 0x348   :  { %1230 = vmatpush3.bf16.msra.mxu0 %v1428_v12 }
 0x349   :  { %1237 = vmatprep.subr.bf16.mxu0 %v1350_v3 }
 0x416   :  { %v331_v48 = vpop.f32.mrb[2].mxu0 }
 0x417   :  { %v332_v49 = vadd.f32 %v331_v48, %v1487_v23  ;;  %v1134_v50 = vpop.f32.mrb[3].mxu0 }
 0x419   :  { %343 = vrot.lane.b32.xlu1 %v332_v49, %s1353_s22  ;;  %v335_v52 = vadd.f32 %v332_v49, %v262_v51 }
 0x41b   :  { %v1044_v53 = vmul.f32 -1.442695, %v335_v52  ;;  %v583_v52 = vld [vmem:[#allocation3 + $0x4] sm:$0x1] }
 0x41d   :  { %1269 = vpow2.f32 %v1044_v53 }
 0x427   :  { %v1270_v54 = vpop.eup %1269 }
 0x428   :  { %v339_v55 = vadd.f32 1.0, %v1270_v54 }
 0x42a   :  { %1271 = vrcp.f32 %v339_v55 }
 0x434   :  { %v1272_v56 = vpop.eup %1271 }
 0x48b   :  { %v344_v57 = vpop.permute.xlu1 %343 }
 0x48c   :  { %v346_v58 = vmul.f32 %v1272_v56, %v344_v57 }
 0x48e   :  { %348 = vrot.lane.b32.xlu0 %v346_v58, %s1353_s22 }
 0x500   :  { %v349_v59 = vpop.permute.xlu0 %348 }
 0x501   :  { %v351_v60 = vadd.f32 %v349_v59, %v262_v51 }
 0x503   :  { %1273 = vtanh.f32 %v351_v60 }
 0x50d   :  { %v1274_v61 = vpop.eup %1273 }
 0x50e   :  { %v353_v62 = vsub.f32 %v256_v46, %v1274_v61 }
 0x510   :  { %355 = vrot.lane.b32.xlu1 %v353_v62, %s1354_s4 }
 0x582   :  { %v356_v63 = vpop.permute.xlu1 %355 }
 0x583   :  { %v358_v0 = vmul.f32 %v1272_v56, %v356_v63 }
 0x585   :  { %360 = vrot.lane.b32.xlu0 %v358_v0, %s1355_s5 }
 0x5f7   :  { %v361_v1 = vpop.permute.xlu0 %360 }
 0x5f8   :  { %v363_v2 = vadd.f32 %v1274_v61, %v361_v1 }
 0x5fa   :  { %365 = vrot.lane.b32.xlu1 %v363_v2, %s1353_s22 }
 0x66c   :  { %v366_v5 = vpop.permute.xlu1 %365 }
 0x66d   :  { %368 = vst.msk [vmem:[#allocation6 + $0x1] sm:$0x1] %vm31_vm1, %v366_v5  ;;  %1144 = vmatmul.mubr.msk.f32.vlgmr.msra.gmra.mrb[2].mxu1 %vm73_vm2, %v366_v5 }
 0x66e   :  { %1233 = vmatpush3.bf16.msra.mxu1 %v1405_v4  ;;  %1165 = vmatprep.mubr.msk.f32.mxu1 %vm1351_vm0, %v1352_v9 }
 0x66f   :  { %1234 = vmatprep.subr.bf16.mxu1 %v1350_v3 }
 0x672   :  { %1236 = vmatpush3.bf16.msra.mxu1 %v1428_v12 }
 0x673   :  { %1243 = vmatprep.subr.bf16.mxu1 %v1350_v3 }
 0x740   :  { %v438_v6 = vpop.f32.mrb[2].mxu1 }
 0x741   :  { %v439_v7 = vadd.f32 %v438_v6, %v1487_v23  ;;  %v1145_v8 = vpop.f32.mrb[3].mxu1 }
 0x743   :  { %450 = vrot.lane.b32.xlu0 %v439_v7, %s1353_s22  ;;  %v442_v11 = vadd.f32 %v439_v7, %v369_v10 }
 0x745   :  { %v1046_v13 = vmul.f32 -1.442695, %v442_v11  ;;  %v690_v11 = vld [vmem:[#allocation3 + $0x5] sm:$0x1] }
 0x747   :  { %1275 = vpow2.f32 %v1046_v13 }
 0x751   :  { %v1276_v14 = vpop.eup %1275 }
 0x752   :  { %v446_v15 = vadd.f32 1.0, %v1276_v14 }
 0x754   :  { %1277 = vrcp.f32 %v446_v15 }
 0x75e   :  { %v1278_v16 = vpop.eup %1277 }
 0x7b5   :  { %v451_v17 = vpop.permute.xlu0 %450 }
 0x7b6   :  { %v453_v18 = vmul.f32 %v1278_v16, %v451_v17 }
 0x7b8   :  { %455 = vrot.lane.b32.xlu1 %v453_v18, %s1353_s22 }
 0x82a   :  { %v456_v19 = vpop.permute.xlu1 %455 }
 0x82b   :  { %v458_v20 = vadd.f32 %v456_v19, %v369_v10 }
 0x82d   :  { %1279 = vtanh.f32 %v458_v20 }
 0x837   :  { %v1280_v21 = vpop.eup %1279 }
 0x838   :  { %v460_v22 = vsub.f32 %v363_v2, %v1280_v21 }
 0x83a   :  { %462 = vrot.lane.b32.xlu0 %v460_v22, %s1354_s4 }
 0x8ac   :  { %v463_v24 = vpop.permute.xlu0 %462 }
 0x8ad   :  { %v465_v25 = vmul.f32 %v1278_v16, %v463_v24 }
 0x8af   :  { %467 = vrot.lane.b32.xlu1 %v465_v25, %s1355_s5 }
 0x921   :  { %v468_v26 = vpop.permute.xlu1 %467 }
 0x922   :  { %v470_v27 = vadd.f32 %v1280_v21, %v468_v26 }
 0x924   :  { %472 = vrot.lane.b32.xlu0 %v470_v27, %s1353_s22 }
 0x996   :  { %v473_v28 = vpop.permute.xlu0 %472 }
 0x997   :  { %475 = vst.msk [vmem:[#allocation6 + $0x2] sm:$0x1] %vm31_vm1, %v473_v28  ;;  %1155 = vmatmul.mubr.msk.f32.vlgmr.msra.gmra.mrb[4].mxu0 %vm73_vm2, %v473_v28 }
 0x998   :  { %1239 = vmatpush3.bf16.msra.mxu0 %v1405_v4  ;;  %1176 = vmatprep.mubr.msk.f32.mxu0 %vm1351_vm0, %v1352_v9 }
 0x999   :  { %1240 = vmatprep.subr.bf16.mxu0 %v1350_v3 }
 0x99c   :  { %1242 = vmatpush3.bf16.msra.mxu0 %v1428_v12 }
 0x99d   :  { %1249 = vmatprep.subr.bf16.mxu0 %v1350_v3 }
 0xa6a   :  { %v545_v29 = vpop.f32.mrb[4].mxu0 }
 0xa6b   :  { %v546_v30 = vadd.f32 %v545_v29, %v1487_v23  ;;  %v1156_v31 = vpop.f32.mrb[5].mxu0  ;;  %v797_v29 = vld [vmem:[#allocation3 + $0x6] sm:$0x1] }
 0xa6d   :  { %557 = vrot.lane.b32.xlu1 %v546_v30, %s1353_s22  ;;  %v549_v33 = vadd.f32 %v546_v30, %v476_v32 }
 0xa6f   :  { %v1048_v34 = vmul.f32 -1.442695, %v549_v33 }
 0xa71   :  { %1281 = vpow2.f32 %v1048_v34 }
 0xa7b   :  { %v1282_v35 = vpop.eup %1281 }
 0xa7c   :  { %v553_v36 = vadd.f32 1.0, %v1282_v35 }
 0xa7e   :  { %1283 = vrcp.f32 %v553_v36 }
 0xa88   :  { %v1284_v37 = vpop.eup %1283 }
 0xadf   :  { %v558_v38 = vpop.permute.xlu1 %557 }
 0xae0   :  { %v560_v39 = vmul.f32 %v1284_v37, %v558_v38 }
 0xae2   :  { %562 = vrot.lane.b32.xlu0 %v560_v39, %s1353_s22 }
 0xb54   :  { %v563_v40 = vpop.permute.xlu0 %562 }
 0xb55   :  { %v565_v41 = vadd.f32 %v563_v40, %v476_v32 }
 0xb57   :  { %1285 = vtanh.f32 %v565_v41 }
 0xb61   :  { %v1286_v42 = vpop.eup %1285 }
 0xb62   :  { %v567_v43 = vsub.f32 %v470_v27, %v1286_v42 }
 0xb64   :  { %569 = vrot.lane.b32.xlu1 %v567_v43, %s1354_s4 }
 0xbd6   :  { %v570_v44 = vpop.permute.xlu1 %569 }
 0xbd7   :  { %v572_v45 = vmul.f32 %v1284_v37, %v570_v44 }
 0xbd9   :  { %574 = vrot.lane.b32.xlu0 %v572_v45, %s1355_s5 }
 0xc4b   :  { %v575_v46 = vpop.permute.xlu0 %574 }
 0xc4c   :  { %v577_v47 = vadd.f32 %v1286_v42, %v575_v46 }
 0xc4e   :  { %579 = vrot.lane.b32.xlu1 %v577_v47, %s1353_s22 }
 0xcc0   :  { %v580_v48 = vpop.permute.xlu1 %579 }
 0xcc1   :  { %582 = vst.msk [vmem:[#allocation6 + $0x3] sm:$0x1] %vm31_vm1, %v580_v48  ;;  %1166 = vmatmul.mubr.msk.f32.vlgmr.msra.gmra.mrb[4].mxu1 %vm73_vm2, %v580_v48 }
 0xcc2   :  { %1245 = vmatpush3.bf16.msra.mxu1 %v1405_v4  ;;  %1187 = vmatprep.mubr.msk.f32.mxu1 %vm1351_vm0, %v1352_v9 }
 0xcc3   :  { %1246 = vmatprep.subr.bf16.mxu1 %v1350_v3 }
 0xcc6   :  { %1248 = vmatpush3.bf16.msra.mxu1 %v1428_v12 }
 0xd94   :  { %v652_v49 = vpop.f32.mrb[4].mxu1 }
 0xd95   :  { %v653_v50 = vadd.f32 %v652_v49, %v1487_v23  ;;  %v1167_v51 = vpop.f32.mrb[5].mxu1  ;;  %v904_v49 = vld [vmem:[#allocation3 + $0x7] sm:$0x1] }
 0xd97   :  { %664 = vrot.lane.b32.xlu0 %v653_v50, %s1353_s22  ;;  %v656_v53 = vadd.f32 %v653_v50, %v583_v52 }
 0xd99   :  { %v1050_v54 = vmul.f32 -1.442695, %v656_v53 }
 0xd9b   :  { %1287 = vpow2.f32 %v1050_v54 }
 0xda5   :  { %v1288_v55 = vpop.eup %1287 }
 0xda6   :  { %v660_v56 = vadd.f32 1.0, %v1288_v55 }
 0xda8   :  { %1289 = vrcp.f32 %v660_v56 }
 0xdb2   :  { %v1290_v57 = vpop.eup %1289 }
 0xe09   :  { %v665_v58 = vpop.permute.xlu0 %664 }
 0xe0a   :  { %v667_v59 = vmul.f32 %v1290_v57, %v665_v58 }
 0xe0c   :  { %669 = vrot.lane.b32.xlu1 %v667_v59, %s1353_s22 }
 0xe7e   :  { %v670_v60 = vpop.permute.xlu1 %669 }
 0xe7f   :  { %v672_v61 = vadd.f32 %v670_v60, %v583_v52 }
 0xe81   :  { %1291 = vtanh.f32 %v672_v61 }
 0xe8b   :  { %v1292_v62 = vpop.eup %1291 }
 0xe8c   :  { %v674_v63 = vsub.f32 %v577_v47, %v1292_v62 }
 0xe8e   :  { %676 = vrot.lane.b32.xlu0 %v674_v63, %s1354_s4 }
 0xf00   :  { %v677_v0 = vpop.permute.xlu0 %676 }
 0xf01   :  { %v679_v1 = vmul.f32 %v1290_v57, %v677_v0 }
 0xf03   :  { %681 = vrot.lane.b32.xlu1 %v679_v1, %s1355_s5 }
 0xf75   :  { %v682_v2 = vpop.permute.xlu1 %681 }
 0xf76   :  { %v684_v5 = vadd.f32 %v1292_v62, %v682_v2 }
 0xf78   :  { %686 = vrot.lane.b32.xlu0 %v684_v5, %s1353_s22 }
 0xfea   :  { %v687_v6 = vpop.permute.xlu0 %686 }
 0xfeb   :  { %689 = vst.msk [vmem:[#allocation6 + $0x4] sm:$0x1] %vm31_vm1, %v687_v6  ;;  %1177 = vmatmul.mubr.msk.f32.vlgmr.msra.gmra.mrb[6].mxu0 %vm73_vm2, %v687_v6 }
 0xfec   :  { %1251 = vmatpush3.bf16.msra.mxu0 %v1405_v4  ;;  %1198 = vmatprep.mubr.msk.f32.mxu0 %vm1351_vm0, %v1352_v9 }
 0xfed   :  { %1252 = vmatprep.subr.bf16.mxu0 %v1350_v3 }
 0xff0   :  { %1254 = vmatpush3.bf16.msra.mxu0 %v1428_v12 }
0x10be   :  { %v759_v7 = vpop.f32.mrb[6].mxu0 }
0x10bf   :  { %v760_v8 = vadd.f32 %v759_v7, %v1487_v23  ;;  %v1178_v10 = vpop.f32.mrb[7].mxu0 }
0x10c1   :  { %771 = vrot.lane.b32.xlu1 %v760_v8, %s1353_s22  ;;  %v763_v13 = vadd.f32 %v760_v8, %v690_v11 }
0x10c3   :  { %v1052_v14 = vmul.f32 -1.442695, %v763_v13 }
0x10c5   :  { %1293 = vpow2.f32 %v1052_v14 }
0x10cf   :  { %v1294_v15 = vpop.eup %1293 }
0x10d0   :  { %v767_v16 = vadd.f32 1.0, %v1294_v15 }
0x10d2   :  { %1295 = vrcp.f32 %v767_v16 }
0x10dc   :  { %v1296_v4 = vpop.eup %1295 }
0x1133   :  { %v772_v17 = vpop.permute.xlu1 %771 }
0x1134   :  { %v774_v9 = vmul.f32 %v1296_v4, %v772_v17 }
0x1136   :  { %776 = vrot.lane.b32.xlu0 %v774_v9, %s1353_s22 }
0x11a8   :  { %v777_v3 = vpop.permute.xlu0 %776 }
0x11a9   :  { %v779_v12 = vadd.f32 %v777_v3, %v690_v11 }
0x11ab   :  { %1297 = vtanh.f32 %v779_v12 }
0x11b5   :  { %v1298_v18 = vpop.eup %1297 }
0x11b6   :  { %v781_v19 = vsub.f32 %v684_v5, %v1298_v18 }
0x11b8   :  { %783 = vrot.lane.b32.xlu1 %v781_v19, %s1354_s4 }
0x122a   :  { %v784_v20 = vpop.permute.xlu1 %783 }
0x122b   :  { %v786_v21 = vmul.f32 %v1296_v4, %v784_v20 }
0x122d   :  { %788 = vrot.lane.b32.xlu0 %v786_v21, %s1355_s5 }
0x129f   :  { %v789_v22 = vpop.permute.xlu0 %788 }
0x12a0   :  { %v791_v24 = vadd.f32 %v1298_v18, %v789_v22 }
0x12a2   :  { %793 = vrot.lane.b32.xlu1 %v791_v24, %s1353_s22 }
0x1314   :  { %v794_v25 = vpop.permute.xlu1 %793 }
0x1315   :  { %796 = vst.msk [vmem:[#allocation6 + $0x5] sm:$0x1] %vm31_vm1, %v794_v25  ;;  %1188 = vmatmul.mubr.msk.f32.vlgmr.msra.gmra.mrb[6].mxu1 %vm73_vm2, %v794_v25 }
0x13e8   :  { %v866_v26 = vpop.f32.mrb[6].mxu1 }
0x13e9   :  { %v867_v27 = vadd.f32 %v866_v26, %v1487_v23  ;;  %v1189_v28 = vpop.f32.mrb[7].mxu1 }
0x13eb   :  { %878 = vrot.lane.b32.xlu0 %v867_v27, %s1353_s22  ;;  %v870_v30 = vadd.f32 %v867_v27, %v797_v29 }
0x13ed   :  { %v1054_v31 = vmul.f32 -1.442695, %v870_v30 }
0x13ef   :  { %1299 = vpow2.f32 %v1054_v31 }
0x13f9   :  { %v1300_v32 = vpop.eup %1299 }
0x13fa   :  { %v874_v33 = vadd.f32 1.0, %v1300_v32 }
0x13fc   :  { %1301 = vrcp.f32 %v874_v33 }
0x1406   :  { %v1302_v34 = vpop.eup %1301 }
0x145d   :  { %v879_v35 = vpop.permute.xlu0 %878 }
0x145e   :  { %v881_v36 = vmul.f32 %v1302_v34, %v879_v35 }
0x1460   :  { %883 = vrot.lane.b32.xlu1 %v881_v36, %s1353_s22 }
0x14d2   :  { %v884_v37 = vpop.permute.xlu1 %883 }
0x14d3   :  { %v886_v38 = vadd.f32 %v884_v37, %v797_v29 }
0x14d5   :  { %1303 = vtanh.f32 %v886_v38 }
0x14df   :  { %v1304_v39 = vpop.eup %1303 }
0x14e0   :  { %v888_v40 = vsub.f32 %v791_v24, %v1304_v39 }
0x14e2   :  { %890 = vrot.lane.b32.xlu0 %v888_v40, %s1354_s4 }
0x1554   :  { %v891_v41 = vpop.permute.xlu0 %890 }
0x1555   :  { %v893_v42 = vmul.f32 %v1302_v34, %v891_v41 }
0x1557   :  { %895 = vrot.lane.b32.xlu1 %v893_v42, %s1355_s5 }
0x15c9   :  { %v896_v43 = vpop.permute.xlu1 %895 }
0x15ca   :  { %v898_v44 = vadd.f32 %v1304_v39, %v896_v43 }
0x15cc   :  { %900 = vrot.lane.b32.xlu0 %v898_v44, %s1353_s22 }
0x163e   :  { %v901_v45 = vpop.permute.xlu0 %900 }
0x163f   :  { %903 = vst.msk [vmem:[#allocation6 + $0x6] sm:$0x1] %vm31_vm1, %v901_v45  ;;  %1199 = vmatmul.mubr.msk.f32.vlgmr.msra.gmra.mrb[8].mxu0 %vm73_vm2, %v901_v45 }
0x1712   :  { %v973_v46 = vpop.f32.mrb[8].mxu0 }
0x1713   :  { %v974_v47 = vadd.f32 %v973_v46, %v1487_v23  ;;  %v1200_v48 = vpop.f32.mrb[9].mxu0 }
0x1715   :  { %985 = vrot.lane.b32.xlu1 %v974_v47, %s1353_s22  ;;  %v977_v50 = vadd.f32 %v974_v47, %v904_v49 }
0x1717   :  { %v1056_v51 = vmul.f32 -1.442695, %v977_v50 }
0x1719   :  { %1305 = vpow2.f32 %v1056_v51 }
0x1723   :  { %v1306_v52 = vpop.eup %1305 }
0x1724   :  { %v981_v53 = vadd.f32 1.0, %v1306_v52 }
0x1726   :  { %1307 = vrcp.f32 %v981_v53 }
0x1730   :  { %v1308_v54 = vpop.eup %1307 }
0x1787   :  { %v986_v55 = vpop.permute.xlu1 %985 }
0x1788   :  { %v988_v56 = vmul.f32 %v1308_v54, %v986_v55 }
0x178a   :  { %990 = vrot.lane.b32.xlu0 %v988_v56, %s1353_s22 }
0x17fc   :  { %v991_v57 = vpop.permute.xlu0 %990 }
0x17fd   :  { %v993_v58 = vadd.f32 %v991_v57, %v904_v49 }
0x17ff   :  { %1309 = vtanh.f32 %v993_v58 }
0x1809   :  { %v1310_v59 = vpop.eup %1309 }
0x180a   :  { %v995_v23 = vsub.f32 %v898_v44, %v1310_v59 }
0x180c   :  { %997 = vrot.lane.b32.xlu1 %v995_v23, %s1354_s4 }
0x187e   :  { %v998_v60 = vpop.permute.xlu1 %997 }
0x187f   :  { %v1000_v61 = vmul.f32 %v1308_v54, %v998_v60 }
0x1881   :  { %1002 = vrot.lane.b32.xlu0 %v1000_v61, %s1355_s5 }
0x18f3   :  { %v1003_v62 = vpop.permute.xlu0 %1002 }
0x18f4   :  { %v1005_v63 = vadd.f32 %v1310_v59, %v1003_v62 }
0x18f6   :  { %1007 = vrot.lane.b32.xlu1 %v1005_v63, %s1353_s22 }
0x1968   :  { %v1008_v0 = vpop.permute.xlu1 %1007 }
0x1969   :  { %1010 = vst.msk [vmem:[#allocation6 + $0x7] sm:$0x1] %vm31_vm1, %v1008_v0 }
0x196a   :  { %1334 = shalt.err (!%p1331_p9)
}
0x196b   :  { %s1335_s29 = scalar_lea.hbm %s1601_s6, 128 }
0x196c   :  { %p1336_p10 = scmp.ne.s32.totalorder %s1601_s6, %s1335_s29  ;;  %p1339_p11 = scmp.lt.u32.totalorder %s1335_s29, %s1601_s6 }
0x196e   :  { %p1341_p12 = pnand %p1339_p11, %p1336_p10 }
0x1970   :  { %1344 = shalt.err (!%p1341_p12)
}
0x1971   :  { %1020 = dma.vmem_to_hbm [thread:$0]  %s1018_s25, 128, %s1601_s6, [#allocation7]  }
0x1972   :  { %1347 = dma.done.wait [#allocation7], 128  }
0x1973   :  { %1348 = vsyncadd [#allocation7], 4294967168 }
0x1974   :  { %1024 = vsyncpa [#allocation7], 1 }

</bundles_post_ra>
